<compile_context>
chip_gen: v7x
topology: tpu7x:2x2x1
jax: 0.10.0
libtpu: 0.0.40
codegen_flags: <defaults>
</compile_context>

<pallas_src>
import jax
import jax.numpy as jnp
from jax.experimental import pallas as pl
from jax.experimental.pallas import tpu as pltpu


def _round_up(n, m):
    return ((n + m - 1) // m) * m


def mlp_kernel(x_ref, w1_ref, b1_ref, w2_ref, b2_ref, w3_ref, b3_ref, o_ref):
    cd = w1_ref.dtype  # compute dtype (bf16 or f32); MXU accumulation is f32
    # fc_1 + relu_1
    h = jnp.dot(x_ref[...], w1_ref[...], preferred_element_type=jnp.float32)
    h = jnp.maximum(h + b1_ref[...], 0.0).astype(cd)
    # fc_2 + relu_2
    h = jnp.dot(h, w2_ref[...], preferred_element_type=jnp.float32)
    h = jnp.maximum(h + b2_ref[...], 0.0).astype(cd)
    # fc_3 + relu_3
    h = jnp.dot(h, w3_ref[...], preferred_element_type=jnp.float32)
    o_ref[...] = jnp.maximum(h + b3_ref[...], 0.0).astype(o_ref.dtype)


def fold_params(params, *, fold=16, compute_dtype=jnp.bfloat16):
    """Precompute block-diagonal (batch-folded) weights ONCE per parameter set.

    Hoisted out of the forward pass per the perf review (block_diag used to be
    re-traced and re-materialized in HBM on every call).
    """
    g = fold
    folded = {}
    for i in (1, 2, 3):
        w, b = params[f"w{i}"], params[f"b{i}"]
        folded[f"w{i}"] = jax.scipy.linalg.block_diag(*([w] * g)).astype(compute_dtype)
        folded[f"b{i}"] = jnp.tile(b, (1, g)).astype(jnp.float32)  # biases stay f32
    return folded


def _mlp_forward(x, folded, *, tile_folded_rows=2048, out_dtype=jnp.bfloat16):
    """x: (N, 8) float32.  folded: output of fold_params().  Returns (N, 10)."""
    n, d_in = x.shape
    w1f, b1f = folded["w1"], folded["b1"]
    w2f, b2f = folded["w2"], folded["b2"]
    w3f, b3f = folded["w3"], folded["b3"]
    cdt = w1f.dtype                                   # compute dtype (bf16 default)
    g = w1f.shape[0] // d_in                          # fold factor
    d_out_f = w3f.shape[1]                            # folded output width (10*g)
    d_out = d_out_f // g

    # --- choose batch tile (in folded rows) -------------------------------
    n_f = pl.cdiv(n, g)                               # folded rows needed
    t_f = min(tile_folded_rows, _round_up(n_f, 8))    # folded rows per grid step
    # v7x megacore: ensure >=2 grid steps when there is enough work so both
    # TensorCores get a share of the "parallel" batch axis.
    if n_f >= 1024:
        t_f = min(t_f, _round_up(pl.cdiv(n_f, 2), 8))
    t_f = max(t_f, 8)
    n_f_pad = _round_up(n_f, t_f)
    n_pad = n_f_pad * g

    # Pad + cast + fold g rows into the lane dim.  Under jit this producer is
    # a single fusion; allow_input_fusion below lets XLA fold it into the
    # pallas_call input DMA instead of an extra HBM pass.
    xp = jnp.zeros((n_pad, d_in), cdt).at[:n].set(x.astype(cdt))
    xf = xp.reshape(n_f_pad, d_in * g)                # (N/G, 8G) lane-dense

    grid = (n_f_pad // t_f,)
    const = lambda i: (0, 0)                          # weights resident in VMEM

    # CostEstimate reflects the actual folded (block-diagonal) MXU work.
    d1, d2, d3 = w1f.shape[1], w2f.shape[1], w3f.shape[1]
    flops = 2 * n_f_pad * (d_in * g * d1 + d1 * d2 + d2 * d3)
    bytes_accessed = (
        n_f_pad * d_in * g * jnp.dtype(cdt).itemsize
        + n_f_pad * d_out_f * jnp.dtype(out_dtype).itemsize
        + sum(int(a.size) * a.dtype.itemsize
              for a in (w1f, b1f, w2f, b2f, w3f, b3f)))

    out_f = pl.pallas_call(
        mlp_kernel,
        out_shape=jax.ShapeDtypeStruct((n_f_pad, d_out_f), out_dtype),
        grid=grid,
        in_specs=[
            pl.BlockSpec((t_f, d_in * g), lambda i: (i, 0)),   # x: batch-tiled
            pl.BlockSpec(w1f.shape, const),
            pl.BlockSpec(b1f.shape, const),
            pl.BlockSpec(w2f.shape, const),
            pl.BlockSpec(b2f.shape, const),
            pl.BlockSpec(w3f.shape, const),
            pl.BlockSpec(b3f.shape, const),
        ],
        out_specs=pl.BlockSpec((t_f, d_out_f), lambda i: (i, 0)),
        compiler_params=pltpu.CompilerParams(
            dimension_semantics=("parallel",),
            vmem_limit_bytes=48 * 1024 * 1024,
            allow_input_fusion=[True, False, False, False, False, False, False],
        ),
        cost_estimate=pl.CostEstimate(
            flops=flops, transcendentals=0, bytes_accessed=bytes_accessed),
    )(xf, w1f, b1f, w2f, b2f, w3f, b3f)

    # Unfold: (N/G, 10G) -> (N, 10), drop padded rows.
    return out_f.reshape(n_pad, d_out)[:n]


mlp_forward = jax.jit(_mlp_forward, static_argnames=("tile_folded_rows", "out_dtype"))


def init_params(key):
    """Deterministic init mimicking nn.Linear default: U(-1/sqrt(fan_in), +)."""
    sizes = [(8, 32), (32, 16), (16, 10)]
    params = {}
    keys = jax.random.split(key, 2 * len(sizes))
    for i, (fan_in, fan_out) in enumerate(sizes):
        bound = 1.0 / jnp.sqrt(jnp.float32(fan_in))
        params[f"w{i+1}"] = jax.random.uniform(
            keys[2 * i], (fan_in, fan_out), jnp.float32, -bound, bound)
        params[f"b{i+1}"] = jax.random.uniform(
            keys[2 * i + 1], (1, fan_out), jnp.float32, -bound, bound)
    return params


def mlp_reference(x, params):
    h = x
    for i in (1, 2, 3):
        h = jnp.maximum(h @ params[f"w{i}"] + params[f"b{i}"], 0.0)
    return h


if __name__ == "__main__":
    key = jax.random.PRNGKey(0)
    k_param, k_x = jax.random.split(key)
    params = init_params(k_param)

    batch = 8
    x = jax.random.normal(k_x, (batch, 8), dtype=jnp.float32)
    ref = mlp_reference(x, params)

    # f32 compute/output path: verifies the fold/unfold layout exactly.
    folded_f32 = fold_params(params, compute_dtype=jnp.float32)
    out_f32 = jax.block_until_ready(
        mlp_forward(x, folded_f32, out_dtype=jnp.float32))
    assert out_f32.shape == (batch, 10), out_f32.shape
    assert jnp.allclose(out_f32, ref, atol=1e-5, rtol=1e-5), "f32 mismatch vs reference"

    # Default fast path: bf16 compute + bf16 output (f32 MXU accumulation).
    folded = fold_params(params)
    out = jax.block_until_ready(mlp_forward(x, folded))
    assert out.shape == (batch, 10), out.shape
    assert out.dtype == jnp.bfloat16, out.dtype
    assert jnp.allclose(out.astype(jnp.float32), ref, atol=5e-2, rtol=5e-2), \
        "bf16 mismatch vs reference"

    print("KERNEL_OK")
</pallas_src>

<mosaic_0001>
module attributes {stable_mosaic.version = 11 : i64} {
  func.func @mlp_kernel(%arg0: i32, %arg1: memref<8x128xf32, #tpu.memory_space<vmem>>, %arg2: memref<128x512xf32, #tpu.memory_space<vmem>>, %arg3: memref<1x512xf32, #tpu.memory_space<vmem>>, %arg4: memref<512x256xf32, #tpu.memory_space<vmem>>, %arg5: memref<1x256xf32, #tpu.memory_space<vmem>>, %arg6: memref<256x160xf32, #tpu.memory_space<vmem>>, %arg7: memref<1x160xf32, #tpu.memory_space<vmem>>, %arg8: memref<8x160xf32, #tpu.memory_space<vmem>>) attributes {dimension_semantics = [#tpu.dimension_semantics<parallel>], iteration_bounds = array<i64: 1>, scalar_prefetch = 0 : i64, scratch_operands = 0 : i64, tpu.core_type = #tpu.core_type<tc>, window_params = [{transform_indices = @transform_0, window_bounds = array<i64: 8, 128>}, {pipeline_mode = #tpu.pipeline_mode<synchronous>, transform_indices = @transform_1, window_bounds = array<i64: 128, 512>}, {pipeline_mode = #tpu.pipeline_mode<synchronous>, transform_indices = @transform_2, window_bounds = array<i64: 1, 512>}, {pipeline_mode = #tpu.pipeline_mode<synchronous>, transform_indices = @transform_3, window_bounds = array<i64: 512, 256>}, {pipeline_mode = #tpu.pipeline_mode<synchronous>, transform_indices = @transform_4, window_bounds = array<i64: 1, 256>}, {pipeline_mode = #tpu.pipeline_mode<synchronous>, transform_indices = @transform_5, window_bounds = array<i64: 256, 160>}, {pipeline_mode = #tpu.pipeline_mode<synchronous>, transform_indices = @transform_6, window_bounds = array<i64: 1, 160>}, {transform_indices = @transform_7, window_bounds = array<i64: 8, 160>}]} {
    %c0 = arith.constant 0 : index
    %c0_0 = arith.constant 0 : index
    %0 = vector.load %arg1[%c0, %c0_0] : memref<8x128xf32, #tpu.memory_space<vmem>>, vector<8x128xf32>
    %c0_1 = arith.constant 0 : index
    %c0_2 = arith.constant 0 : index
    %1 = vector.load %arg2[%c0_1, %c0_2] : memref<128x512xf32, #tpu.memory_space<vmem>>, vector<128x512xf32>
    %cst = arith.constant dense<0.000000e+00> : vector<8x512xf32>
    %2 = tpu.matmul %0, %1, %cst {dimension_numbers = #tpu.dot_dimension_numbers<[1], [0], [0], [1], [0, 0, 1, 1], [], []>} : vector<8x128xf32>, vector<128x512xf32>, vector<8x512xf32> -> vector<8x512xf32>
    %c0_3 = arith.constant 0 : index
    %c0_4 = arith.constant 0 : index
    %3 = vector.load %arg3[%c0_3, %c0_4] : memref<1x512xf32, #tpu.memory_space<vmem>>, vector<1x512xf32>
    %4 = vector.broadcast %3 : vector<1x512xf32> to vector<8x512xf32>
    %5 = arith.addf %2, %4 : vector<8x512xf32>
    %cst_5 = arith.constant 0.000000e+00 : f32
    %6 = vector.broadcast %cst_5 : f32 to vector<8x512xf32>
    %7 = arith.maximumf %5, %6 : vector<8x512xf32>
    %c0_6 = arith.constant 0 : index
    %c0_7 = arith.constant 0 : index
    %8 = vector.load %arg4[%c0_6, %c0_7] : memref<512x256xf32, #tpu.memory_space<vmem>>, vector<512x256xf32>
    %cst_8 = arith.constant dense<0.000000e+00> : vector<8x256xf32>
    %9 = tpu.matmul %7, %8, %cst_8 {dimension_numbers = #tpu.dot_dimension_numbers<[1], [0], [0], [1], [0, 0, 1, 1], [], []>} : vector<8x512xf32>, vector<512x256xf32>, vector<8x256xf32> -> vector<8x256xf32>
    %c0_9 = arith.constant 0 : index
    %c0_10 = arith.constant 0 : index
    %10 = vector.load %arg5[%c0_9, %c0_10] : memref<1x256xf32, #tpu.memory_space<vmem>>, vector<1x256xf32>
    %11 = vector.broadcast %10 : vector<1x256xf32> to vector<8x256xf32>
    %12 = arith.addf %9, %11 : vector<8x256xf32>
    %cst_11 = arith.constant 0.000000e+00 : f32
    %13 = vector.broadcast %cst_11 : f32 to vector<8x256xf32>
    %14 = arith.maximumf %12, %13 : vector<8x256xf32>
    %c0_12 = arith.constant 0 : index
    %c0_13 = arith.constant 0 : index
    %15 = vector.load %arg6[%c0_12, %c0_13] : memref<256x160xf32, #tpu.memory_space<vmem>>, vector<256x160xf32>
    %cst_14 = arith.constant dense<0.000000e+00> : vector<8x160xf32>
    %16 = tpu.matmul %14, %15, %cst_14 {dimension_numbers = #tpu.dot_dimension_numbers<[1], [0], [0], [1], [0, 0, 1, 1], [], []>} : vector<8x256xf32>, vector<256x160xf32>, vector<8x160xf32> -> vector<8x160xf32>
    %c0_15 = arith.constant 0 : index
    %c0_16 = arith.constant 0 : index
    %17 = vector.load %arg7[%c0_15, %c0_16] : memref<1x160xf32, #tpu.memory_space<vmem>>, vector<1x160xf32>
    %18 = vector.broadcast %17 : vector<1x160xf32> to vector<8x160xf32>
    %19 = arith.addf %16, %18 : vector<8x160xf32>
    %cst_17 = arith.constant 0.000000e+00 : f32
    %20 = vector.broadcast %cst_17 : f32 to vector<8x160xf32>
    %21 = arith.maximumf %19, %20 : vector<8x160xf32>
    %c0_18 = arith.constant 0 : index
    %c0_19 = arith.constant 0 : index
    %22 = vector.load %arg8[%c0_18, %c0_19] : memref<8x160xf32, #tpu.memory_space<vmem>>, vector<8x160xf32>
    tpu.vector_store %arg8[%c0_18, %c0_19], %21 {strides = array<i32>} : memref<8x160xf32, #tpu.memory_space<vmem>>, vector<8x160xf32>,
    return
  }
  func.func @transform_0(%arg0: i32) -> (i32, i32) {
    %c0_i32 = arith.constant 0 : i32
    %c0_i32_0 = arith.constant 0 : i32
    return %arg0, %c0_i32 : i32, i32
  }
  func.func @transform_1(%arg0: i32) -> (i32, i32) {
    %c0_i32 = arith.constant 0 : i32
    %c0_i32_0 = arith.constant 0 : i32
    %c0_i32_1 = arith.constant 0 : i32
    return %c0_i32, %c0_i32_0 : i32, i32
  }
  func.func @transform_2(%arg0: i32) -> (i32, i32) {
    %c0_i32 = arith.constant 0 : i32
    %c0_i32_0 = arith.constant 0 : i32
    %c0_i32_1 = arith.constant 0 : i32
    return %c0_i32, %c0_i32_0 : i32, i32
  }
  func.func @transform_3(%arg0: i32) -> (i32, i32) {
    %c0_i32 = arith.constant 0 : i32
    %c0_i32_0 = arith.constant 0 : i32
    %c0_i32_1 = arith.constant 0 : i32
    return %c0_i32, %c0_i32_0 : i32, i32
  }
  func.func @transform_4(%arg0: i32) -> (i32, i32) {
    %c0_i32 = arith.constant 0 : i32
    %c0_i32_0 = arith.constant 0 : i32
    %c0_i32_1 = arith.constant 0 : i32
    return %c0_i32, %c0_i32_0 : i32, i32
  }
  func.func @transform_5(%arg0: i32) -> (i32, i32) {
    %c0_i32 = arith.constant 0 : i32
    %c0_i32_0 = arith.constant 0 : i32
    %c0_i32_1 = arith.constant 0 : i32
    return %c0_i32, %c0_i32_0 : i32, i32
  }
  func.func @transform_6(%arg0: i32) -> (i32, i32) {
    %c0_i32 = arith.constant 0 : i32
    %c0_i32_0 = arith.constant 0 : i32
    %c0_i32_1 = arith.constant 0 : i32
    return %c0_i32, %c0_i32_0 : i32, i32
  }
  func.func @transform_7(%arg0: i32) -> (i32, i32) {
    %c0_i32 = arith.constant 0 : i32
    %c0_i32_0 = arith.constant 0 : i32
    return %arg0, %c0_i32 : i32, i32
  }
}

</mosaic_0001>

<bundles_post_ra>
// kernel: _mlp_forward.1
= control target key start
LH: loop header
LB: loop body
LE: loop exit
PB: predicated region body
PF: predicated region fallthrough
CT: control target
= control target key end

     0   :  { %12 = vsyncpa [#allocation3], 0  ;;  %s1002_s24 = smov [#allocation2]   ;;  %s1683_s0 = inlined_call_operand.vmem [shape: f32[8,128], index: 0, kind: input, shape index: {}]   ;;  %s1684_s1 = inlined_call_operand.hbm [shape: f32[128,512], index: 1, kind: input, shape index: {}]   ;;  %s1685_s2 = inlined_call_operand.vmem [shape: f32[1,512], index: 2, kind: input, shape index: {}]   ;;  %s1686_s3 = inlined_call_operand.vmem [shape: f32[512,256], index: 3, kind: input, shape index: {}]   ;;  %s1687_s4 = inlined_call_operand.vmem [shape: f32[1,256], index: 4, kind: input, shape index: {}]   ;;  %s1688_s5 = inlined_call_operand.vmem [shape: f32[256,160], index: 5, kind: input, shape index: {}]   ;;  %s1689_s6 = inlined_call_operand.vmem [shape: f32[1,160], index: 6, kind: input, shape index: {}]   ;;  %s1690_s7 = inlined_call_operand.vmem [shape: f32[8,160], index: 7, kind: output, shape index: {}]  }
   0x1   :  { %s20_s25 = sshll.u32 %s1002_s24, 4  ;;  %s978_s28 = scalar_lea.hbm %s1684_s1, 8192  ;;  %s21_s25 = int_to_ptr.vmem [resolvable:$true] %s20_s25 }
   0x2   :  { %p979_p0 = scmp.ne.s32.totalorder %s1684_s1, %s978_s28  ;;  %p982_p1 = scmp.lt.u32.totalorder %s978_s28, %s1684_s1 }
   0x4   :  { %p984_p2 = pnand %p982_p1, %p979_p0 }
   0x6   :  { %987 = shalt.err (!%p984_p2)
}
   0x7   :  { %s988_s10 = scalar_lea.vmem %s21_s25, 8192  ;;  %p993_p4 = scmp.lt.s32.totalorder %s21_s25, %s21_s25 }
   0x8   :  { %p989_p3 = scmp.ne.s32.totalorder %s21_s25, %s988_s10  ;;  %p994_p5 = scmp.lt.s32.totalorder %s988_s10, %s988_s10 }
   0xa   :  { %p995_p6 = por %p994_p5, %p993_p4 }
   0xc   :  { %p996_p7 = pnand %p995_p6, %p989_p3 }
   0xe   :  { %999 = shalt.err (!%p996_p7)
}
   0xf   :  { %s1003_s11 = smov 512   ;;  %s1004_s12 = smov 32  }
  0x10   :  { %26 = dma.hbm_to_vmem [thread:$0]  %s1684_s1, 8192, %s21_s25, [#allocation3], %s1003_s11, %s1003_s11, %s1004_s12  }
  0x11   :  { %1000 = dma.done.wait [#allocation3], 8192  }
  0x12   :  { %1001 = vsyncadd [#allocation3], 4294959104  ;;  %v1005_v0 = vmov 0.0   ;;  %v42_v1 = vld [vmem:[#allocation2 + $0x8] sm:$0xff]  ;;  %v41_v3 = vld [vmem:[#allocation2] sm:$0xff]  ;;  %vm707_vm0 = vcmask 261120  }
  0x13   :  { %191 = vmatprep.mubr.f32.mxu1 %v1005_v0  ;;  %v46_v2 = vld [vmem:[#allocation2 + $0x28] sm:$0xff]  ;;  %v45_v5 = vld [vmem:[#allocation2 + $0x20] sm:$0xff]  ;;  %v276_v45 = vld [vmem:[%s1686_s3 + $0x18] sm:$0xff] }
  0x14   :  { %v714_v4 = vpack.c.bf16 %v46_v2, %v42_v1  ;;  %v50_v6 = vld [vmem:[#allocation2 + $0x48] sm:$0xff]  ;;  %v716_v8 = vpack.c.bf16 %v45_v5, %v41_v3  ;;  %v49_v10 = vld [vmem:[#allocation2 + $0x40] sm:$0xff]  ;;  %v275_v47 = vld [vmem:[%s1686_s3 + $0x10] sm:$0xff] }
  0x15   :  { %v54_v7 = vld [vmem:[#allocation2 + $0x68] sm:$0xff]  ;;  %v53_v11 = vld [vmem:[#allocation2 + $0x60] sm:$0xff]  ;;  %v280_v51 = vld [vmem:[%s1686_s3 + $0x38] sm:$0xff] }
  0x16   :  { %v718_v9 = vpack.c.bf16 %v54_v7, %v50_v6  ;;  %v58_v12 = vld [vmem:[#allocation2 + $0x88] sm:$0xff]  ;;  %715 = vmatprep.subr.bf16.mxu1 %v714_v4  ;;  %v720_v14 = vpack.c.bf16 %v53_v11, %v49_v10  ;;  %v57_v16 = vld [vmem:[#allocation2 + $0x80] sm:$0xff]  ;;  %v279_v55 = vld [vmem:[%s1686_s3 + $0x30] sm:$0xff] }
  0x17   :  { %v62_v13 = vld [vmem:[#allocation2 + $0xa8] sm:$0xff]  ;;  %717 = vmatpush1.bf16.msra.mxu1 %v716_v8  ;;  %v61_v17 = vld [vmem:[#allocation2 + $0xa0] sm:$0xff]  ;;  %v284_v57 = vld [vmem:[%s1686_s3 + $0x58] sm:$0xff] }
  0x18   :  { %719 = vmatprep.subr.bf16.mxu1 %v718_v9  ;;  %v722_v15 = vpack.c.bf16 %v62_v13, %v58_v12  ;;  %v66_v18 = vld [vmem:[#allocation2 + $0xc8] sm:$0xff]  ;;  %v724_v20 = vpack.c.bf16 %v61_v17, %v57_v16  ;;  %v65_v22 = vld [vmem:[#allocation2 + $0xc0] sm:$0xff]  ;;  %v44_v61 = vld [vmem:[#allocation2 + $0x18] sm:$0xff] }
  0x19   :  { %v70_v19 = vld [vmem:[#allocation2 + $0xe8] sm:$0xff]  ;;  %v69_v23 = vld [vmem:[#allocation2 + $0xe0] sm:$0xff]  ;;  %v48_v62 = vld [vmem:[#allocation2 + $0x38] sm:$0xff] }
  0x1a   :  { %v726_v21 = vpack.c.bf16 %v70_v19, %v66_v18  ;;  %v74_v24 = vld [vmem:[#allocation2 + $0x108] sm:$0xff]  ;;  %v728_v26 = vpack.c.bf16 %v69_v23, %v65_v22  ;;  %v73_v28 = vld [vmem:[#allocation2 + $0x100] sm:$0xff]  ;;  %v283_v3 = vld [vmem:[%s1686_s3 + $0x50] sm:$0xff]  ;;  %v746_v7 = vpack.c.bf16 %v48_v62, %v44_v61 }
  0x1b   :  { %721 = vmatpush1.bf16.msra.mxu1 %v720_v14  ;;  %v78_v25 = vld [vmem:[#allocation2 + $0x128] sm:$0xff]  ;;  %v77_v29 = vld [vmem:[#allocation2 + $0x120] sm:$0xff]  ;;  %v288_v6 = vld [vmem:[%s1686_s3 + $0x78] sm:$0xff] }
  0x1c   :  { %723 = vmatprep.subr.bf16.mxu1 %v722_v15  ;;  %v730_v27 = vpack.c.bf16 %v78_v25, %v74_v24  ;;  %v82_v30 = vld [vmem:[#allocation2 + $0x148] sm:$0xff]  ;;  %v732_v32 = vpack.c.bf16 %v77_v29, %v73_v28  ;;  %v81_v34 = vld [vmem:[#allocation2 + $0x140] sm:$0xff]  ;;  %v43_v8 = vld [vmem:[#allocation2 + $0x10] sm:$0xff] }
  0x1d   :  { %v86_v31 = vld [vmem:[#allocation2 + $0x168] sm:$0xff]  ;;  %v85_v35 = vld [vmem:[#allocation2 + $0x160] sm:$0xff]  ;;  %v47_v9 = vld [vmem:[#allocation2 + $0x30] sm:$0xff] }
  0x1e   :  { %v734_v33 = vpack.c.bf16 %v86_v31, %v82_v30  ;;  %v90_v36 = vld [vmem:[#allocation2 + $0x188] sm:$0xff]  ;;  %v736_v38 = vpack.c.bf16 %v85_v35, %v81_v34  ;;  %v89_v39 = vld [vmem:[#allocation2 + $0x180] sm:$0xff]  ;;  %v52_v10 = vld [vmem:[#allocation2 + $0x58] sm:$0xff]  ;;  %v748_v17 = vpack.c.bf16 %v47_v9, %v43_v8 }
  0x1f   :  { %725 = vmatpush1.bf16.msra.mxu1 %v724_v20  ;;  %v94_v37 = vld [vmem:[#allocation2 + $0x1a8] sm:$0xff]  ;;  %v93_v40 = vld [vmem:[#allocation2 + $0x1a0] sm:$0xff]  ;;  %v56_v11 = vld [vmem:[#allocation2 + $0x78] sm:$0xff] }
  0x20   :  { %727 = vmatprep.subr.bf16.mxu1 %v726_v21  ;;  %v738_v41 = vpack.c.bf16 %v94_v37, %v90_v36  ;;  %v98_v42 = vld [vmem:[#allocation2 + $0x1c8] sm:$0xff]  ;;  %v273_v46 = vld [vmem:[%s1686_s3] sm:$0xff]  ;;  %v740_v53 = vpack.c.bf16 %v93_v40, %v89_v39  ;;  %v287_v15 = vld [vmem:[%s1686_s3 + $0x70] sm:$0xff]  ;;  %v750_v20 = vpack.c.bf16 %v56_v11, %v52_v10 }
  0x21   :  { %v102_v43 = vld [vmem:[#allocation2 + $0x1e8] sm:$0xff]  ;;  %v780_v49 = vpack.c.bf16 %v275_v47, %v273_v46  ;;  %v277_v52 = vld [vmem:[%s1686_s3 + $0x20] sm:$0xff]  ;;  %v292_v19 = vld [vmem:[%s1686_s3 + $0x98] sm:$0xff] }
  0x22   :  { %v274_v44 = vld [vmem:[%s1686_s3 + $0x8] sm:$0xff]  ;;  %v742_v58 = vpack.c.bf16 %v102_v43, %v98_v42  ;;  %v97_v59 = vld [vmem:[#allocation2 + $0x1c0] sm:$0xff]  ;;  %v784_v63 = vpack.c.bf16 %v279_v55, %v277_v52  ;;  %v51_v21 = vld [vmem:[#allocation2 + $0x50] sm:$0xff] }
  0x23   :  { %729 = vmatpush1.bf16.msra.mxu1 %v728_v26  ;;  %v778_v48 = vpack.c.bf16 %v276_v45, %v274_v44  ;;  %v278_v50 = vld [vmem:[%s1686_s3 + $0x28] sm:$0xff]  ;;  %v101_v60 = vld [vmem:[#allocation2 + $0x1e0] sm:$0xff]  ;;  %v55_v22 = vld [vmem:[#allocation2 + $0x70] sm:$0xff] }
  0x24   :  { %731 = vmatprep.subr.bf16.mxu1 %v730_v27  ;;  %v782_v54 = vpack.c.bf16 %v280_v51, %v278_v50  ;;  %v282_v56 = vld [vmem:[%s1686_s3 + $0x48] sm:$0xff]  ;;  %v281_v2 = vld [vmem:[%s1686_s3 + $0x40] sm:$0xff]  ;;  %v744_v4 = vpack.c.bf16 %v101_v60, %v97_v59  ;;  %v60_v23 = vld [vmem:[#allocation2 + $0x98] sm:$0xff]  ;;  %v752_v29 = vpack.c.bf16 %v55_v22, %v51_v21 }
  0x25   :  { %779 = vmatprep.subr.bf16.mxu0 %v778_v48  ;;  %v786_v1 = vpack.c.bf16 %v284_v57, %v282_v56  ;;  %v286_v5 = vld [vmem:[%s1686_s3 + $0x68] sm:$0xff]  ;;  %v788_v12 = vpack.c.bf16 %v283_v3, %v281_v2  ;;  %v285_v14 = vld [vmem:[%s1686_s3 + $0x60] sm:$0xff]  ;;  %v64_v24 = vld [vmem:[#allocation2 + $0xb8] sm:$0xff] }
  0x26   :  { %781 = vmatpush1.bf16.msra.mxu0 %v780_v49  ;;  %v790_v13 = vpack.c.bf16 %v288_v6, %v286_v5  ;;  %v1110_v16 = vld [vmem:[%s1683_s0] sm:$0xff]  ;;  %v290_v18 = vld [vmem:[%s1686_s3 + $0x88] sm:$0xff]  ;;  %v792_v25 = vpack.c.bf16 %v287_v15, %v285_v14  ;;  %v291_v28 = vld [vmem:[%s1686_s3 + $0x90] sm:$0xff] }
  0x27   :  { %733 = vmatpush1.bf16.msra.mxu1 %v732_v32  ;;  %783 = vmatprep.subr.bf16.mxu0 %v782_v54  ;;  %v794_v26 = vpack.c.bf16 %v292_v19, %v290_v18  ;;  %v289_v27 = vld [vmem:[%s1686_s3 + $0x80] sm:$0xff]  ;;  %v294_v30 = vld [vmem:[%s1686_s3 + $0xa8] sm:$0xff]  ;;  %v296_v31 = vld [vmem:[%s1686_s3 + $0xb8] sm:$0xff]  ;;  %v754_v32 = vpack.c.bf16 %v64_v24, %v60_v23 }
  0x28   :  { %735 = vmatprep.subr.bf16.mxu1 %v734_v33  ;;  %v59_v33 = vld [vmem:[#allocation2 + $0x90] sm:$0xff]  ;;  %v68_v35 = vld [vmem:[#allocation2 + $0xd8] sm:$0xff]  ;;  %v796_v37 = vpack.c.bf16 %v291_v28, %v289_v27  ;;  %v297_v50 = vld [vmem:[%s1686_s3 + $0xc0] sm:$0xff] }
  0x29   :  { %v63_v34 = vld [vmem:[#allocation2 + $0xb0] sm:$0xff]  ;;  %v72_v36 = vld [vmem:[#allocation2 + $0xf8] sm:$0xff]  ;;  %v301_v62 = vld [vmem:[%s1686_s3 + $0xe0] sm:$0xff] }
  0x2a   :  { %785 = vmatpush1.bf16.msra.mxu0 %v784_v63  ;;  %v295_v39 = vld [vmem:[%s1686_s3 + $0xb0] sm:$0xff]  ;;  %v756_v40 = vpack.c.bf16 %v63_v34, %v59_v33  ;;  %v300_v42 = vld [vmem:[%s1686_s3 + $0xd8] sm:$0xff]  ;;  %v758_v43 = vpack.c.bf16 %v72_v36, %v68_v35  ;;  %v306_v2 = vld [vmem:[%s1686_s3 + $0x108] sm:$0xff] }
  0x2b   :  { %737 = vmatpush1.bf16.msra.mxu1 %v736_v38  ;;  %787 = vmatprep.subr.bf16.mxu0 %v786_v1  ;;  %v798_v38 = vpack.c.bf16 %v296_v31, %v294_v30  ;;  %v67_v44 = vld [vmem:[#allocation2 + $0xd0] sm:$0xff]  ;;  %v76_v46 = vld [vmem:[#allocation2 + $0x118] sm:$0xff]  ;;  %v305_v11 = vld [vmem:[%s1686_s3 + $0x100] sm:$0xff] }
  0x2c   :  { %739 = vmatprep.subr.bf16.mxu1 %v738_v41  ;;  %v298_v41 = vld [vmem:[%s1686_s3 + $0xc8] sm:$0xff]  ;;  %v71_v45 = vld [vmem:[#allocation2 + $0xf0] sm:$0xff]  ;;  %v80_v47 = vld [vmem:[#allocation2 + $0x138] sm:$0xff] }
  0x2d   :  { %v802_v49 = vpack.c.bf16 %v300_v42, %v298_v41  ;;  %v299_v51 = vld [vmem:[%s1686_s3 + $0xd0] sm:$0xff]  ;;  %v760_v52 = vpack.c.bf16 %v71_v45, %v67_v44  ;;  %v304_v54 = vld [vmem:[%s1686_s3 + $0xf8] sm:$0xff]  ;;  %v762_v55 = vpack.c.bf16 %v80_v47, %v76_v46  ;;  %v310_v14 = vld [vmem:[%s1686_s3 + $0x128] sm:$0xff] }
  0x2e   :  { %789 = vmatpush1.bf16.msra.mxu0 %v788_v12  ;;  %v75_v56 = vld [vmem:[#allocation2 + $0x110] sm:$0xff]  ;;  %v88_v59 = vld [vmem:[#allocation2 + $0x178] sm:$0xff]  ;;  %v804_v60 = vpack.c.bf16 %v299_v51, %v297_v50  ;;  %v309_v24 = vld [vmem:[%s1686_s3 + $0x120] sm:$0xff] }
  0x2f   :  { %741 = vmatpush1.bf16.msra.mxu1 %v740_v53  ;;  %791 = vmatprep.subr.bf16.mxu0 %v790_v13  ;;  %v302_v53 = vld [vmem:[%s1686_s3 + $0xe8] sm:$0xff]  ;;  %v79_v57 = vld [vmem:[#allocation2 + $0x130] sm:$0xff]  ;;  %v308_v3 = vld [vmem:[%s1686_s3 + $0x118] sm:$0xff] }
  0x30   :  { %743 = vmatprep.subr.bf16.mxu1 %v742_v58  ;;  %v84_v58 = vld [vmem:[#allocation2 + $0x158] sm:$0xff]  ;;  %v806_v61 = vpack.c.bf16 %v304_v54, %v302_v53  ;;  %v303_v63 = vld [vmem:[%s1686_s3 + $0xf0] sm:$0xff]  ;;  %v764_v1 = vpack.c.bf16 %v79_v57, %v75_v56  ;;  %v810_v10 = vpack.c.bf16 %v308_v3, %v306_v2  ;;  %v314_v27 = vld [vmem:[%s1686_s3 + $0x148] sm:$0xff] }
  0x31   :  { %v83_v5 = vld [vmem:[#allocation2 + $0x150] sm:$0xff]  ;;  %v96_v8 = vld [vmem:[#allocation2 + $0x1b8] sm:$0xff]  ;;  %v808_v9 = vpack.c.bf16 %v303_v63, %v301_v62  ;;  %v313_v34 = vld [vmem:[%s1686_s3 + $0x140] sm:$0xff] }
  0x32   :  { %793 = vmatpush1.bf16.msra.mxu0 %v792_v25  ;;  %v87_v6 = vld [vmem:[#allocation2 + $0x170] sm:$0xff]  ;;  %v312_v15 = vld [vmem:[%s1686_s3 + $0x138] sm:$0xff]  ;;  %v322_v42 = vld [vmem:[%s1686_s3 + $0x188] sm:$0xff] }
  0x33   :  { %745 = vmatpush1.bf16.msra.mxu1 %v744_v4  ;;  %795 = vmatprep.subr.bf16.mxu0 %v794_v26  ;;  %v766_v4 = vpack.c.bf16 %v88_v59, %v84_v58  ;;  %v307_v12 = vld [vmem:[%s1686_s3 + $0x110] sm:$0xff]  ;;  %v768_v13 = vpack.c.bf16 %v87_v6, %v83_v5  ;;  %v104_v21 = vld [vmem:[#allocation2 + $0x1f8] sm:$0xff]  ;;  %v814_v23 = vpack.c.bf16 %v312_v15, %v310_v14  ;;  %v321_v46 = vld [vmem:[%s1686_s3 + $0x180] sm:$0xff] }
  0x34   :  { %747 = vmatprep.subr.bf16.mxu1 %v746_v7  ;;  %v92_v7 = vld [vmem:[#allocation2 + $0x198] sm:$0xff]  ;;  %v91_v18 = vld [vmem:[#allocation2 + $0x190] sm:$0xff]  ;;  %v812_v22 = vpack.c.bf16 %v307_v12, %v305_v11  ;;  %v325_v51 = vld [vmem:[%s1686_s3 + $0x1a0] sm:$0xff] }
  0x35   :  { %v95_v19 = vld [vmem:[#allocation2 + $0x1b0] sm:$0xff]  ;;  %v316_v28 = vld [vmem:[%s1686_s3 + $0x158] sm:$0xff]  ;;  %v330_v53 = vld [vmem:[%s1686_s3 + $0x1c8] sm:$0xff] }
  0x36   :  { %192 = vmatmul.mubr.f32.vlgmr.msra.gmra.mrb[0].mxu1 %v1110_v16  ;;  %797 = vmatpush1.bf16.msra.mxu0 %v796_v37  ;;  %v311_v25 = vld [vmem:[%s1686_s3 + $0x130] sm:$0xff]  ;;  %v772_v26 = vpack.c.bf16 %v95_v19, %v91_v18  ;;  %v818_v33 = vpack.c.bf16 %v316_v28, %v314_v27  ;;  %v318_v37 = vld [vmem:[%s1686_s3 + $0x168] sm:$0xff]  ;;  %v332_v54 = vld [vmem:[%s1686_s3 + $0x1d8] sm:$0xff] }
  0x37   :  { %749 = vmatpush1.bf16.msra.mxu1 %v748_v17  ;;  %262 = vmatprep.mubr.f32.mxu1 %v1005_v0  ;;  %v293_v0 = vld [vmem:[%s1686_s3 + $0xa0] sm:$0xff]  ;;  %v770_v17 = vpack.c.bf16 %v96_v8, %v92_v7  ;;  %v99_v30 = vld [vmem:[#allocation2 + $0x1d0] sm:$0xff]  ;;  %v834_v56 = vpack.c.bf16 %v332_v54, %v330_v53  ;;  %v338_v3 = vld [vmem:[%s1686_s3 + $0x208] sm:$0xff] }
  0x38   :  { %751 = vmatprep.subr.bf16.mxu1 %v750_v20  ;;  %v800_v48 = vpack.c.bf16 %v295_v39, %v293_v0  ;;  %799 = vmatprep.subr.bf16.mxu0 %v798_v38  ;;  %v100_v20 = vld [vmem:[#allocation2 + $0x1d8] sm:$0xff]  ;;  %v103_v31 = vld [vmem:[#allocation2 + $0x1f0] sm:$0xff]  ;;  %v329_v57 = vld [vmem:[%s1686_s3 + $0x1c0] sm:$0xff] }
  0x39   :  { %v315_v35 = vld [vmem:[%s1686_s3 + $0x150] sm:$0xff]  ;;  %v776_v36 = vpack.c.bf16 %v103_v31, %v99_v30  ;;  %v320_v38 = vld [vmem:[%s1686_s3 + $0x178] sm:$0xff]  ;;  %v333_v63 = vld [vmem:[%s1686_s3 + $0x1e0] sm:$0xff] }
  0x3a   :  { %801 = vmatpush1.bf16.msra.mxu0 %v800_v48  ;;  %v820_v0 = vpack.c.bf16 %v315_v35, %v313_v34  ;;  %v822_v39 = vpack.c.bf16 %v320_v38, %v318_v37  ;;  %v319_v41 = vld [vmem:[%s1686_s3 + $0x170] sm:$0xff]  ;;  %v326_v48 = vld [vmem:[%s1686_s3 + $0x1a8] sm:$0xff]  ;;  %v560_v7 = vld [vmem:[%s1688_s5 + $0x18] sm:$0xff] }
  0x3b   :  { %753 = vmatpush1.bf16.msra.mxu1 %v752_v29  ;;  %803 = vmatprep.subr.bf16.mxu0 %v802_v49  ;;  %v774_v29 = vpack.c.bf16 %v104_v21, %v100_v20  ;;  %v323_v47 = vld [vmem:[%s1686_s3 + $0x190] sm:$0xff]  ;;  %v328_v49 = vld [vmem:[%s1686_s3 + $0x1b8] sm:$0xff]  ;;  %v558_v6 = vld [vmem:[%s1688_s5 + $0x8] sm:$0xff] }
  0x3c   :  { %755 = vmatprep.subr.bf16.mxu1 %v754_v32  ;;  %v816_v32 = vpack.c.bf16 %v311_v25, %v309_v24  ;;  %v830_v50 = vpack.c.bf16 %v328_v49, %v326_v48  ;;  %v331_v58 = vld [vmem:[%s1686_s3 + $0x1d0] sm:$0xff]  ;;  %v557_v8 = vld [vmem:[%s1688_s5] sm:$0xff]  ;;  %v562_v11 = vld [vmem:[%s1688_s5 + $0x28] sm:$0xff] }
  0x3d   :  { %v836_v59 = vpack.c.bf16 %v331_v58, %v329_v57  ;;  %v564_v12 = vld [vmem:[%s1688_s5 + $0x38] sm:$0xff]  ;;  %v561_v15 = vld [vmem:[%s1688_s5 + $0x20] sm:$0xff]  ;;  %v566_v18 = vld [vmem:[%s1688_s5 + $0x48] sm:$0xff] }
  0x3e   :  { %805 = vmatpush1.bf16.msra.mxu0 %v804_v60  ;;  %v334_v60 = vld [vmem:[%s1686_s3 + $0x1e8] sm:$0xff]  ;;  %v910_v14 = vpack.c.bf16 %v564_v12, %v562_v11  ;;  %v568_v19 = vld [vmem:[%s1688_s5 + $0x58] sm:$0xff]  ;;  %v569_v28 = vld [vmem:[%s1688_s5 + $0x60] sm:$0xff] }
  0x3f   :  { %757 = vmatpush1.bf16.msra.mxu1 %v756_v40  ;;  %807 = vmatprep.subr.bf16.mxu0 %v806_v61  ;;  %v317_v40 = vld [vmem:[%s1686_s3 + $0x160] sm:$0xff]  ;;  %v336_v61 = vld [vmem:[%s1686_s3 + $0x1f8] sm:$0xff]  ;;  %v914_v21 = vpack.c.bf16 %v568_v19, %v566_v18  ;;  %v570_v24 = vld [vmem:[%s1688_s5 + $0x68] sm:$0xff] }
  0x40   :  { %759 = vmatprep.subr.bf16.mxu1 %v758_v43  ;;  %v324_v43 = vld [vmem:[%s1686_s3 + $0x198] sm:$0xff]  ;;  %v824_v44 = vpack.c.bf16 %v319_v41, %v317_v40  ;;  %v838_v62 = vpack.c.bf16 %v336_v61, %v334_v60  ;;  %v574_v30 = vld [vmem:[%s1688_s5 + $0x88] sm:$0xff]  ;;  %v573_v34 = vld [vmem:[%s1688_s5 + $0x80] sm:$0xff] }
  0x41   :  { %v826_v45 = vpack.c.bf16 %v324_v43, %v322_v42  ;;  %v572_v25 = vld [vmem:[%s1688_s5 + $0x78] sm:$0xff]  ;;  %v575_v35 = vld [vmem:[%s1688_s5 + $0x90] sm:$0xff]  ;;  %v582_v41 = vld [vmem:[%s1688_s5 + $0xc8] sm:$0xff] }
  0x42   :  { %809 = vmatpush1.bf16.msra.mxu0 %v808_v9  ;;  %v906_v9 = vpack.c.bf16 %v560_v7, %v558_v6  ;;  %v918_v27 = vpack.c.bf16 %v572_v25, %v570_v24  ;;  %v576_v31 = vld [vmem:[%s1688_s5 + $0x98] sm:$0xff]  ;;  %v924_v38 = vpack.c.bf16 %v575_v35, %v573_v34  ;;  %v579_v40 = vld [vmem:[%s1688_s5 + $0xb0] sm:$0xff]  ;;  %v594_v58 = vld [vmem:[%s1688_s5 + $0x128] sm:$0xff] }
  0x43   :  { %761 = vmatpush1.bf16.msra.mxu1 %v760_v52  ;;  %811 = vmatprep.subr.bf16.mxu0 %v810_v10  ;;  %v327_v52 = vld [vmem:[%s1686_s3 + $0x1b0] sm:$0xff]  ;;  %v580_v37 = vld [vmem:[%s1688_s5 + $0xb8] sm:$0xff]  ;;  %v602_v7 = vld [vmem:[%s1688_s5 + $0x168] sm:$0xff] }
  0x44   :  { %763 = vmatprep.subr.bf16.mxu1 %v762_v55  ;;  %v832_v55 = vpack.c.bf16 %v327_v52, %v325_v51  ;;  %v559_v10 = vld [vmem:[%s1688_s5 + $0x10] sm:$0xff]  ;;  %v584_v42 = vld [vmem:[%s1688_s5 + $0xd8] sm:$0xff]  ;;  %v590_v52 = vld [vmem:[%s1688_s5 + $0x108] sm:$0xff] }
  0x45   :  { %v588_v48 = vld [vmem:[%s1688_s5 + $0xf8] sm:$0xff]  ;;  %v587_v51 = vld [vmem:[%s1688_s5 + $0xf0] sm:$0xff]  ;;  %v601_v11 = vld [vmem:[%s1688_s5 + $0x160] sm:$0xff] }
  0x46   :  { %813 = vmatpush1.bf16.msra.mxu0 %v812_v22  ;;  %v565_v22 = vld [vmem:[%s1688_s5 + $0x40] sm:$0xff]  ;;  %v592_v53 = vld [vmem:[%s1688_s5 + $0x118] sm:$0xff]  ;;  %v591_v57 = vld [vmem:[%s1688_s5 + $0x110] sm:$0xff] }
  0x47   :  { %765 = vmatpush1.bf16.msra.mxu1 %v764_v1  ;;  %815 = vmatprep.subr.bf16.mxu0 %v814_v23  ;;  %v335_v1 = vld [vmem:[%s1686_s3 + $0x1f0] sm:$0xff]  ;;  %v605_v19 = vld [vmem:[%s1688_s5 + $0x180] sm:$0xff] }
  0x48   :  { %767 = vmatprep.subr.bf16.mxu1 %v766_v4  ;;  %v840_v2 = vpack.c.bf16 %v335_v1, %v333_v63  ;;  %v340_v4 = vld [vmem:[%s1686_s3 + $0x218] sm:$0xff]  ;;  %v567_v23 = vld [vmem:[%s1688_s5 + $0x50] sm:$0xff]  ;;  %v598_v1 = vld [vmem:[%s1688_s5 + $0x148] sm:$0xff] }
  0x49   :  { %v842_v5 = vpack.c.bf16 %v340_v4, %v338_v3  ;;  %v595_v63 = vld [vmem:[%s1688_s5 + $0x130] sm:$0xff] }
  0x4a   :  { %817 = vmatpush1.bf16.msra.mxu0 %v816_v32  ;;  %v599_v6 = vld [vmem:[%s1688_s5 + $0x150] sm:$0xff] }
  0x4b   :  { %769 = vmatpush1.bf16.msra.mxu1 %v768_v13  ;;  %819 = vmatprep.subr.bf16.mxu0 %v818_v33  ;;  %v908_v13 = vpack.c.bf16 %v559_v10, %v557_v8  ;;  %v922_v33 = vpack.c.bf16 %v576_v31, %v574_v30  ;;  %v604_v8 = vld [vmem:[%s1688_s5 + $0x178] sm:$0xff]  ;;  %v603_v12 = vld [vmem:[%s1688_s5 + $0x170] sm:$0xff]  ;;  %v1447_v31 = vld [vmem:[%s1685_s2] sm:$0xf] }
  0x4c   :  { %771 = vmatprep.subr.bf16.mxu1 %v770_v17  ;;  %v563_v17 = vld [vmem:[%s1688_s5 + $0x30] sm:$0xff]  ;;  %v950_v10 = vpack.c.bf16 %v604_v8, %v602_v7  ;;  %v616_v30 = vld [vmem:[%s1688_s5 + $0x1d8] sm:$0xff]  ;;  %v357_v8 = vld [vmem:[%s1686_s3 + $0x2a0] sm:$0xff] }
  0x4d   :  { %v912_v20 = vpack.c.bf16 %v563_v17, %v561_v15  ;;  %v608_v15 = vld [vmem:[%s1688_s5 + $0x198] sm:$0xff]  ;;  %v952_v17 = vpack.c.bf16 %v603_v12, %v601_v11 }
  0x4e   :  { %821 = vmatpush1.bf16.msra.mxu0 %v820_v0  ;;  %v364_v11 = vld [vmem:[%s1686_s3 + $0x2d8] sm:$0xff] }
  0x4f   :  { %773 = vmatpush1.bf16.msra.mxu1 %v772_v26  ;;  %823 = vmatprep.subr.bf16.mxu0 %v822_v39  ;;  %v916_v26 = vpack.c.bf16 %v567_v23, %v565_v22  ;;  %v577_v39 = vld [vmem:[%s1688_s5 + $0xa0] sm:$0xff]  ;;  %v610_v22 = vld [vmem:[%s1688_s5 + $0x1a8] sm:$0xff]  ;;  %v612_v23 = vld [vmem:[%s1688_s5 + $0x1b8] sm:$0xff] }
  0x50   :  { %775 = vmatprep.subr.bf16.mxu1 %v774_v29  ;;  %v571_v29 = vld [vmem:[%s1688_s5 + $0x70] sm:$0xff]  ;;  %v928_v43 = vpack.c.bf16 %v579_v40, %v577_v39  ;;  %v958_v25 = vpack.c.bf16 %v612_v23, %v610_v22  ;;  %v337_v39 = vld [vmem:[%s1686_s3 + $0x200] sm:$0xff] }
  0x51   :  { %v920_v32 = vpack.c.bf16 %v571_v29, %v569_v28  ;;  %v614_v29 = vld [vmem:[%s1688_s5 + $0x1c8] sm:$0xff]  ;;  %v339_v40 = vld [vmem:[%s1686_s3 + $0x210] sm:$0xff]  ;;  %v365_v23 = vld [vmem:[%s1686_s3 + $0x2e0] sm:$0xff] }
  0x52   :  { %825 = vmatpush1.bf16.msra.mxu0 %v824_v44  ;;  %v930_v44 = vpack.c.bf16 %v584_v42, %v582_v41  ;;  %v962_v34 = vpack.c.bf16 %v616_v30, %v614_v29  ;;  %v342_v42 = vld [vmem:[%s1686_s3 + $0x228] sm:$0xff] }
  0x53   :  { %777 = vmatpush1.bf16.msra.mxu1 %v776_v36  ;;  %827 = vmatprep.subr.bf16.mxu0 %v826_v45  ;;  %v578_v36 = vld [vmem:[%s1688_s5 + $0xa8] sm:$0xff]  ;;  %v581_v45 = vld [vmem:[%s1688_s5 + $0xc0] sm:$0xff] }
  0x54   :  { %907 = vmatprep.subr.bf16.mxu1 %v906_v9  ;;  %v926_v0 = vpack.c.bf16 %v580_v37, %v578_v36 }
  0x56   :  { %263 = vmatmul.mubr.f32.vlgmr.msra.gmra.mrb[2].mxu1 %v1110_v16  ;;  %v828_v16 = vpack.c.bf16 %v323_v47, %v321_v46  ;;  %v583_v46 = vld [vmem:[%s1688_s5 + $0xd0] sm:$0xff]  ;;  %v586_v47 = vld [vmem:[%s1688_s5 + $0xe8] sm:$0xff] }
  0x57   :  { %909 = vmatpush1.bf16.msra.mxu1 %v908_v13  ;;  %v932_v49 = vpack.c.bf16 %v583_v46, %v581_v45  ;;  %v107_v13 = vlaneseq  ;;  %v844_v45 = vpack.c.bf16 %v339_v40, %v337_v39 }
  0x58   :  { %829 = vmatpush1.bf16.msra.mxu0 %v828_v16  ;;  %911 = vmatprep.subr.bf16.mxu1 %v910_v14  ;;  %v934_v16 = vpack.c.bf16 %v588_v48, %v586_v47  ;;  %v606_v14 = vld [vmem:[%s1688_s5 + $0x188] sm:$0xff]  ;;  %v341_v48 = vld [vmem:[%s1686_s3 + $0x220] sm:$0xff] }
  0x59   :  { %831 = vmatprep.subr.bf16.mxu0 %v830_v50  ;;  %v585_v50 = vld [vmem:[%s1688_s5 + $0xe0] sm:$0xff]  ;;  %v954_v18 = vpack.c.bf16 %v608_v15, %v606_v14  ;;  %v363_v15 = vld [vmem:[%s1686_s3 + $0x2d0] sm:$0xff] }
  0x5a   :  { %v936_v54 = vpack.c.bf16 %v587_v51, %v585_v50  ;;  %v348_v50 = vld [vmem:[%s1686_s3 + $0x258] sm:$0xff]  ;;  %v361_v14 = vld [vmem:[%s1686_s3 + $0x2c0] sm:$0xff] }
  0x5b   :  { %913 = vmatpush1.bf16.msra.mxu1 %v912_v20  ;;  %v607_v20 = vld [vmem:[%s1688_s5 + $0x190] sm:$0xff] }
  0x5c   :  { %833 = vmatpush1.bf16.msra.mxu0 %v832_v55  ;;  %915 = vmatprep.subr.bf16.mxu1 %v914_v21  ;;  %v938_v55 = vpack.c.bf16 %v592_v53, %v590_v52  ;;  %v1421_v21 = vshrl.u32 %v107_v13, 7  ;;  %v956_v24 = vpack.c.bf16 %v607_v20, %v605_v19  ;;  %v345_v53 = vld [vmem:[%s1686_s3 + $0x240] sm:$0xff]  ;;  %v868_v20 = vpack.c.bf16 %v363_v15, %v361_v14 }
  0x5d   :  { %835 = vmatprep.subr.bf16.mxu0 %v834_v56  ;;  %v589_v56 = vld [vmem:[%s1688_s5 + $0x100] sm:$0xff] }
  0x5e   :  { %v940_v60 = vpack.c.bf16 %v591_v57, %v589_v56  ;;  %v1436_v28 = vsub.s32 0, %v1421_v21  ;;  %v352_v56 = vld [vmem:[%s1686_s3 + $0x278] sm:$0xff]  ;;  %v121_v19 = vsub.s32 3, %v1421_v21  ;;  %v397_v15 = vld [vmem:[%s1686_s3 + $0x3e0] sm:$0xff] }
  0x5f   :  { %917 = vmatpush1.bf16.msra.mxu1 %v916_v26  ;;  %v609_v26 = vld [vmem:[%s1688_s5 + $0x1a0] sm:$0xff] }
  0x60   :  { %837 = vmatpush1.bf16.msra.mxu0 %v836_v59  ;;  %919 = vmatprep.subr.bf16.mxu1 %v918_v27  ;;  %v596_v59 = vld [vmem:[%s1688_s5 + $0x138] sm:$0xff]  ;;  %v611_v27 = vld [vmem:[%s1688_s5 + $0x1b0] sm:$0xff]  ;;  %v110_v35 = vrot.slane %v1447_v31, %v1436_v28 }
  0x61   :  { %839 = vmatprep.subr.bf16.mxu0 %v838_v62  ;;  %v942_v61 = vpack.c.bf16 %v596_v59, %v594_v58  ;;  %v593_v62 = vld [vmem:[%s1688_s5 + $0x120] sm:$0xff] }
  0x62   :  { %v944_v3 = vpack.c.bf16 %v595_v63, %v593_v62  ;;  %v349_v59 = vld [vmem:[%s1686_s3 + $0x260] sm:$0xff]  ;;  %v356_v62 = vld [vmem:[%s1686_s3 + $0x298] sm:$0xff] }
  0x63   :  { %921 = vmatpush1.bf16.msra.mxu1 %v920_v32  ;;  %v1450_v32 = vsub.s32 1, %v1421_v21 }
  0x64   :  { %841 = vmatpush1.bf16.msra.mxu0 %v840_v2  ;;  %923 = vmatprep.subr.bf16.mxu1 %v922_v33  ;;  %v600_v2 = vld [vmem:[%s1688_s5 + $0x158] sm:$0xff]  ;;  %v960_v33 = vpack.c.bf16 %v611_v27, %v609_v26  ;;  %v122_v27 = vrot.slane %v1447_v31, %v121_v19 }
  0x65   :  { %843 = vmatprep.subr.bf16.mxu0 %v842_v5  ;;  %v946_v4 = vpack.c.bf16 %v600_v2, %v598_v1  ;;  %v597_v5 = vld [vmem:[%s1688_s5 + $0x140] sm:$0xff]  ;;  %v114_v36 = vrot.slane %v1447_v31, %v1450_v32  ;;  %v372_v26 = vld [vmem:[%s1686_s3 + $0x318] sm:$0xff] }
  0x66   :  { %v948_v9 = vpack.c.bf16 %v599_v6, %v597_v5  ;;  %v353_v2 = vld [vmem:[%s1686_s3 + $0x280] sm:$0xff]  ;;  %v360_v5 = vld [vmem:[%s1686_s3 + $0x2b8] sm:$0xff] }
  0x67   :  { %925 = vmatpush1.bf16.msra.mxu1 %v924_v38 }
  0x68   :  { %927 = vmatprep.subr.bf16.mxu1 %v926_v0 }
  0x6b   :  { %929 = vmatpush1.bf16.msra.mxu1 %v928_v43  ;;  %v344_v43 = vld [vmem:[%s1686_s3 + $0x238] sm:$0xff] }
  0x6c   :  { %931 = vmatprep.subr.bf16.mxu1 %v930_v44  ;;  %v846_v47 = vpack.c.bf16 %v344_v43, %v342_v42  ;;  %v373_v42 = vld [vmem:[%s1686_s3 + $0x320] sm:$0xff]  ;;  %v375_v43 = vld [vmem:[%s1686_s3 + $0x330] sm:$0xff] }
  0x6f   :  { %933 = vmatpush1.bf16.msra.mxu1 %v932_v49  ;;  %v343_v49 = vld [vmem:[%s1686_s3 + $0x230] sm:$0xff] }
  0x70   :  { %935 = vmatprep.subr.bf16.mxu1 %v934_v16  ;;  %v346_v16 = vld [vmem:[%s1686_s3 + $0x248] sm:$0xff]  ;;  %v848_v51 = vpack.c.bf16 %v343_v49, %v341_v48  ;;  %v377_v48 = vld [vmem:[%s1686_s3 + $0x340] sm:$0xff]  ;;  %v379_v49 = vld [vmem:[%s1686_s3 + $0x350] sm:$0xff] }
  0x71   :  { %v850_v52 = vpack.c.bf16 %v348_v50, %v346_v16  ;;  %v382_v16 = vld [vmem:[%s1686_s3 + $0x368] sm:$0xff]  ;;  %v384_v50 = vld [vmem:[%s1686_s3 + $0x378] sm:$0xff] }
  0x73   :  { %937 = vmatpush1.bf16.msra.mxu1 %v936_v54  ;;  %v347_v54 = vld [vmem:[%s1686_s3 + $0x250] sm:$0xff] }
  0x74   :  { %939 = vmatprep.subr.bf16.mxu1 %v938_v55  ;;  %v350_v55 = vld [vmem:[%s1686_s3 + $0x268] sm:$0xff]  ;;  %v852_v57 = vpack.c.bf16 %v347_v54, %v345_v53  ;;  %v381_v53 = vld [vmem:[%s1686_s3 + $0x360] sm:$0xff]  ;;  %v383_v54 = vld [vmem:[%s1686_s3 + $0x370] sm:$0xff] }
  0x75   :  { %v854_v58 = vpack.c.bf16 %v352_v56, %v350_v55  ;;  %v386_v55 = vld [vmem:[%s1686_s3 + $0x388] sm:$0xff]  ;;  %v388_v56 = vld [vmem:[%s1686_s3 + $0x398] sm:$0xff] }
  0x77   :  { %941 = vmatpush1.bf16.msra.mxu1 %v940_v60  ;;  %v351_v60 = vld [vmem:[%s1686_s3 + $0x270] sm:$0xff] }
  0x78   :  { %943 = vmatprep.subr.bf16.mxu1 %v942_v61  ;;  %v354_v61 = vld [vmem:[%s1686_s3 + $0x288] sm:$0xff]  ;;  %v856_v63 = vpack.c.bf16 %v351_v60, %v349_v59  ;;  %v385_v59 = vld [vmem:[%s1686_s3 + $0x380] sm:$0xff]  ;;  %v387_v60 = vld [vmem:[%s1686_s3 + $0x390] sm:$0xff] }
  0x79   :  { %v858_v1 = vpack.c.bf16 %v356_v62, %v354_v61  ;;  %v390_v61 = vld [vmem:[%s1686_s3 + $0x3a8] sm:$0xff]  ;;  %v392_v62 = vld [vmem:[%s1686_s3 + $0x3b8] sm:$0xff] }
  0x7b   :  { %945 = vmatpush1.bf16.msra.mxu1 %v944_v3  ;;  %v355_v3 = vld [vmem:[%s1686_s3 + $0x290] sm:$0xff] }
  0x7c   :  { %947 = vmatprep.subr.bf16.mxu1 %v946_v4  ;;  %v358_v4 = vld [vmem:[%s1686_s3 + $0x2a8] sm:$0xff]  ;;  %v860_v6 = vpack.c.bf16 %v355_v3, %v353_v2  ;;  %v389_v2 = vld [vmem:[%s1686_s3 + $0x3a0] sm:$0xff]  ;;  %v391_v3 = vld [vmem:[%s1686_s3 + $0x3b0] sm:$0xff] }
  0x7d   :  { %v862_v7 = vpack.c.bf16 %v360_v5, %v358_v4  ;;  %v394_v4 = vld [vmem:[%s1686_s3 + $0x3c8] sm:$0xff]  ;;  %v396_v5 = vld [vmem:[%s1686_s3 + $0x3d8] sm:$0xff] }
  0x7f   :  { %949 = vmatpush1.bf16.msra.mxu1 %v948_v9  ;;  %v359_v9 = vld [vmem:[%s1686_s3 + $0x2b0] sm:$0xff] }
  0x80   :  { %951 = vmatprep.subr.bf16.mxu1 %v950_v10  ;;  %v362_v10 = vld [vmem:[%s1686_s3 + $0x2c8] sm:$0xff]  ;;  %v864_v12 = vpack.c.bf16 %v359_v9, %v357_v8  ;;  %v898_v8 = vpack.c.bf16 %v396_v5, %v394_v4  ;;  %v393_v9 = vld [vmem:[%s1686_s3 + $0x3c0] sm:$0xff] }
  0x81   :  { %v866_v13 = vpack.c.bf16 %v364_v11, %v362_v10  ;;  %v395_v10 = vld [vmem:[%s1686_s3 + $0x3d0] sm:$0xff]  ;;  %v398_v11 = vld [vmem:[%s1686_s3 + $0x3e8] sm:$0xff] }
  0x83   :  { %953 = vmatpush1.bf16.msra.mxu1 %v952_v17  ;;  %v366_v17 = vld [vmem:[%s1686_s3 + $0x2e8] sm:$0xff] }
  0x84   :  { %955 = vmatprep.subr.bf16.mxu1 %v954_v18  ;;  %v368_v18 = vld [vmem:[%s1686_s3 + $0x2f8] sm:$0xff] }
  0x85   :  { %v870_v22 = vpack.c.bf16 %v368_v18, %v366_v17  ;;  %v399_v17 = vld [vmem:[%s1686_s3 + $0x3f0] sm:$0xff] }
  0x86   :  { %v904_v18 = vpack.c.bf16 %v399_v17, %v397_v15 }
  0x87   :  { %957 = vmatpush1.bf16.msra.mxu1 %v956_v24  ;;  %v367_v24 = vld [vmem:[%s1686_s3 + $0x2f0] sm:$0xff] }
  0x88   :  { %959 = vmatprep.subr.bf16.mxu1 %v958_v25  ;;  %v370_v25 = vld [vmem:[%s1686_s3 + $0x308] sm:$0xff]  ;;  %v872_v29 = vpack.c.bf16 %v367_v24, %v365_v23 }
  0x89   :  { %v618_v24 = vld [vmem:[%s1688_s5 + $0x1e8] sm:$0xff] }
  0x8b   :  { %961 = vmatpush1.bf16.msra.mxu1 %v960_v33  ;;  %v874_v33 = vpack.c.bf16 %v372_v26, %v370_v25  ;;  %v620_v25 = vld [vmem:[%s1688_s5 + $0x1f8] sm:$0xff] }
  0x8c   :  { %963 = vmatprep.subr.bf16.mxu1 %v962_v34  ;;  %v369_v34 = vld [vmem:[%s1686_s3 + $0x300] sm:$0xff]  ;;  %v966_v26 = vpack.c.bf16 %v620_v25, %v618_v24 }
 0x109   :  { %v193_v37 = vpop.f32.mrb[0].mxu1 }
 0x10a   :  { %v194_v38 = vadd.f32 %v193_v37, %v110_v35  ;;  %v195_v0 = vpop.f32.mrb[1].mxu1  ;;  %v371_v35 = vld [vmem:[%s1686_s3 + $0x310] sm:$0xff]  ;;  %v374_v37 = vld [vmem:[%s1686_s3 + $0x328] sm:$0xff] }
 0x10b   :  { %v196_v41 = vadd.f32 %v195_v0, %v114_v36  ;;  %v876_v39 = vpack.c.bf16 %v371_v35, %v369_v34 }
 0x10c   :  { %v269_v46 = vmax.f32 %v194_v38, 0.0  ;;  %v376_v38 = vld [vmem:[%s1686_s3 + $0x338] sm:$0xff] }
 0x10d   :  { %v270_v44 = vmax.f32 %v196_v41, 0.0  ;;  %v878_v41 = vpack.c.bf16 %v376_v38, %v374_v37 }
 0x10f   :  { %477 = vmatprep.mubr.f32.mxu0 %v270_v44  ;;  %v378_v44 = vld [vmem:[%s1686_s3 + $0x348] sm:$0xff] }
 0x110   :  { %478 = vmatmul.mubr.f32.vlgmr.msra.gmra.mrb[0].mxu0 %v269_v46  ;;  %v880_v46 = vpack.c.bf16 %v375_v43, %v373_v42 }
 0x111   :  { %845 = vmatpush1.bf16.msra.mxu0 %v844_v45  ;;  %v380_v45 = vld [vmem:[%s1686_s3 + $0x358] sm:$0xff] }
 0x112   :  { %847 = vmatprep.subr.bf16.mxu0 %v846_v47  ;;  %v882_v47 = vpack.c.bf16 %v380_v45, %v378_v44 }
 0x115   :  { %849 = vmatpush1.bf16.msra.mxu0 %v848_v51  ;;  %v884_v51 = vpack.c.bf16 %v379_v49, %v377_v48 }
 0x116   :  { %851 = vmatprep.subr.bf16.mxu0 %v850_v52  ;;  %v886_v52 = vpack.c.bf16 %v384_v50, %v382_v16 }
 0x119   :  { %853 = vmatpush1.bf16.msra.mxu0 %v852_v57  ;;  %v888_v57 = vpack.c.bf16 %v383_v54, %v381_v53 }
 0x11a   :  { %855 = vmatprep.subr.bf16.mxu0 %v854_v58  ;;  %v890_v58 = vpack.c.bf16 %v388_v56, %v386_v55 }
 0x11d   :  { %857 = vmatpush1.bf16.msra.mxu0 %v856_v63  ;;  %v892_v63 = vpack.c.bf16 %v387_v60, %v385_v59 }
 0x11e   :  { %859 = vmatprep.subr.bf16.mxu0 %v858_v1  ;;  %v894_v1 = vpack.c.bf16 %v392_v62, %v390_v61 }
 0x121   :  { %861 = vmatpush1.bf16.msra.mxu0 %v860_v6  ;;  %v896_v6 = vpack.c.bf16 %v391_v3, %v389_v2 }
 0x122   :  { %863 = vmatprep.subr.bf16.mxu0 %v862_v7  ;;  %v117_v7 = vsub.s32 2, %v1421_v21 }
 0x124   :  { %v118_v21 = vrot.slane %v1447_v31, %v117_v7  ;;  %v613_v31 = vld [vmem:[%s1688_s5 + $0x1c0] sm:$0xff] }
 0x125   :  { %865 = vmatpush1.bf16.msra.mxu0 %v864_v12  ;;  %v400_v12 = vld [vmem:[%s1686_s3 + $0x3f8] sm:$0xff] }
 0x126   :  { %867 = vmatprep.subr.bf16.mxu0 %v866_v13  ;;  %v900_v13 = vpack.c.bf16 %v395_v10, %v393_v9  ;;  %v902_v14 = vpack.c.bf16 %v400_v12, %v398_v11 }
 0x129   :  { %869 = vmatpush1.bf16.msra.mxu0 %v868_v20  ;;  %v1554_v30 = vpop.f32.mrb[2].mxu1 }
 0x12a   :  { %871 = vmatprep.subr.bf16.mxu0 %v870_v22  ;;  %v266_v36 = vpop.f32.mrb[3].mxu1  ;;  %v265_v19 = vadd.f32 %v1554_v30, %v118_v21  ;;  %v615_v22 = vld [vmem:[%s1688_s5 + $0x1d0] sm:$0xff] }
 0x12b   :  { %v267_v0 = vadd.f32 %v266_v36, %v122_v27  ;;  %v964_v23 = vpack.c.bf16 %v615_v22, %v613_v31  ;;  %v617_v27 = vld [vmem:[%s1688_s5 + $0x1e0] sm:$0xff] }
 0x12c   :  { %v271_v20 = vmax.f32 %v265_v19, 0.0 }
 0x12d   :  { %873 = vmatpush1.bf16.msra.mxu0 %v872_v29  ;;  %v272_v40 = vmax.f32 %v267_v0, 0.0  ;;  %965 = vmatpush1.bf16.msra.mxu1 %v964_v23  ;;  %v619_v29 = vld [vmem:[%s1688_s5 + $0x1f0] sm:$0xff] }
 0x12e   :  { %875 = vmatprep.subr.bf16.mxu0 %v874_v33  ;;  %v968_v30 = vpack.c.bf16 %v619_v29, %v617_v27  ;;  %967 = vmatprep.subr.bf16.mxu1 %v966_v26  ;;  %v401_v33 = vld [vmem:[%s1687_s4] sm:$0x3] }
 0x12f   :  { %548 = vmatprep.mubr.f32.mxu0 %v272_v40  ;;  %v406_v34 = vrot.slane %v401_v33, %v1436_v28  ;;  %v410_v35 = vrot.slane %v401_v33, %v1450_v32 }
 0x131   :  { %877 = vmatpush1.bf16.msra.mxu0 %v876_v39  ;;  %969 = vmatpush1.bf16.msra.mxu1 %v968_v30 }
 0x132   :  { %879 = vmatprep.subr.bf16.mxu0 %v878_v41  ;;  %v621_v41 = vld [vmem:[%s1689_s6] sm:$0x3] }
 0x133   :  { %v626_v42 = vrot.slane %v621_v41, %v1436_v28  ;;  %v630_v43 = vrot.slane %v621_v41, %v1450_v32 }
 0x135   :  { %881 = vmatpush1.bf16.msra.mxu0 %v880_v46 }
 0x136   :  { %883 = vmatprep.subr.bf16.mxu0 %v882_v47 }
 0x139   :  { %885 = vmatpush1.bf16.msra.mxu0 %v884_v51 }
 0x13a   :  { %887 = vmatprep.subr.bf16.mxu0 %v886_v52 }
 0x13d   :  { %889 = vmatpush1.bf16.msra.mxu0 %v888_v57 }
 0x13e   :  { %891 = vmatprep.subr.bf16.mxu0 %v890_v58 }
 0x141   :  { %893 = vmatpush1.bf16.msra.mxu0 %v892_v63 }
 0x142   :  { %895 = vmatprep.subr.bf16.mxu0 %v894_v1 }
 0x145   :  { %897 = vmatpush1.bf16.msra.mxu0 %v896_v6 }
 0x146   :  { %899 = vmatprep.subr.bf16.mxu0 %v898_v8 }
 0x149   :  { %901 = vmatpush1.bf16.msra.mxu0 %v900_v13 }
 0x14a   :  { %903 = vmatprep.subr.bf16.mxu0 %v902_v14 }
 0x14d   :  { %905 = vmatpush1.bf16.msra.mxu0 %v904_v18 }
 0x150   :  { %549 = vmatmul.mubr.f32.vlgmr.msra.gmra.mrb[0].mxu0 %v271_v20 }
 0x223   :  { %v550_v36 = vpop.f32.mrb[0].mxu0 }
 0x224   :  { %v970_v37 = vadd.f32 %v550_v36, %v406_v34  ;;  %v552_v38 = vpop.f32.mrb[1].mxu0 }
 0x225   :  { %v971_v0 = vadd.f32 %v552_v38, %v410_v35 }
 0x226   :  { %v555_v40 = vmax.f32 %v970_v37, 0.0 }
 0x227   :  { %v556_v39 = vmax.f32 %v971_v0, 0.0 }
 0x229   :  { %697 = vmatprep.mubr.f32.mxu1 %v556_v39 }
 0x22a   :  { %698 = vmatmul.mubr.f32.vlgmr.msra.gmra.mrb[4].mxu1 %v555_v40 }
 0x2fd   :  { %v699_v44 = vpop.f32.mrb[4].mxu1 }
 0x2fe   :  { %v700_v45 = vadd.f32 %v699_v44, %v626_v42  ;;  %v701_v46 = vpop.f32.mrb[5].mxu1 }
 0x2ff   :  { %v702_v47 = vadd.f32 %v701_v46, %v630_v43 }
 0x300   :  { %v704_v48 = vmax.f32 %v700_v45, 0.0 }
 0x301   :  { %v705_v49 = vmax.f32 %v702_v47, 0.0 }
 0x302   :  { %706 = vst [vmem:[%s1690_s7] sm:$0xff] %v704_v48 }
 0x303   :  { %708 = vst.msk [vmem:[%s1690_s7 + $0x8] sm:$0xff] %vm707_vm0, %v705_v49 }
 0x304   :  { %713 = vsyncpa [#allocation3], 1 }

</bundles_post_ra>
